<compile_context>
chip_gen: v6e
topology: v6e:2x2x1
jax: 0.10.0
libtpu: 0.0.40
codegen_flags: <defaults>
</compile_context>

<pallas_src>
import jax
import jax.numpy as jnp
from jax.experimental import pallas as pl
from jax.experimental.pallas import tpu as pltpu

LEAKY_SLOPE = 0.2
BN_EPS = 1e-5


def _leaky(z):
    # max(z, 0.2*z) == LeakyReLU(0.2) for slope < 1; cheaper than cmp+select.
    return jnp.maximum(z, LEAKY_SLOPE * z)


def nonlocal_mp_kernel(par_ref, f_ref, o_ref):
    # par_ref: SMEM f32[18]  (w1, b1, w2, b2, w3, b3, folded Conv+BN scale/shift)
    # f_ref:   VMEM (B_TILE, V, C_TILE)  -- F with channels on the lane axis
    # o_ref:   VMEM (B_TILE, V, C_TILE)
    f = f_ref[...]                                   # (bt, V, ct)

    w100 = par_ref[0]; w101 = par_ref[1]
    w110 = par_ref[2]; w111 = par_ref[3]
    b10 = par_ref[4]; b11 = par_ref[5]
    w200 = par_ref[6]; w201 = par_ref[7]
    w210 = par_ref[8]; w211 = par_ref[9]
    b20 = par_ref[10]; b21 = par_ref[11]
    w30 = par_ref[12]; w31 = par_ref[13]; b3 = par_ref[14]
    s0 = par_ref[15]; s1 = par_ref[16]; sh = par_ref[17]

    # Layer 1 (Linear(2,2)) is separable in (i, j): O(V*C) precompute.
    # torch cat order is (F[j], F[i]) -> h1_k = w1[k,0]*F[j] + w1[k,1]*F[i] + b1[k].
    p0 = (w100 * f)[:, :, None, :]                   # (bt, Vj, 1, ct)   j-part
    p1 = (w110 * f)[:, :, None, :]
    q0 = (w101 * f + b10)[:, None, :, :]             # (bt, 1, Vi, ct)   i-part
    q1 = (w111 * f + b11)[:, None, :, :]

    h10 = _leaky(p0 + q0)                            # (bt, Vj, Vi, ct)
    h11 = _leaky(p1 + q1)
    # Linear(2,2) + LeakyReLU
    h20 = _leaky(w200 * h10 + w201 * h11 + b20)
    h21 = _leaky(w210 * h10 + w211 * h11 + b21)
    # Linear(2,1) + LeakyReLU
    r = _leaky(w30 * h20 + w31 * h21 + b3)           # (bt, Vj, Vi, ct)

    # torch.sum(M, -2): sum over j.  j is a non-minor axis -> plain VPU adds.
    m = jnp.sum(r, axis=1)                           # (bt, Vi, ct)

    # Fusion: Conv2d(2,1,1) + BatchNorm2d(1) (eval) + LeakyReLU, folded to scale/shift.
    o_ref[...] = _leaky(s0 * f + s1 * m + sh)


def _choose_tiles(B, V, C, budget_bytes=8 << 20):
    """Pick (b_tile, c_tile): ~8 live f32 copies of the (bt, V, V, ct) pairwise
    tensor must fit `budget_bytes`.  c_tile is a multiple of 128 dividing C, or
    the full C (BlockSpec (8,128) rule); b_tile divides B."""
    def work(bt, ct):
        return 8 * bt * V * V * ct * 4

    c_tile = C
    if C % 128 == 0:
        while (c_tile > 128 and work(1, c_tile) > budget_bytes
               and (c_tile // 2) % 128 == 0 and C % (c_tile // 2) == 0):
            c_tile //= 2

    b_tile = 1
    for cand in range(B, 0, -1):
        if B % cand == 0 and work(cand, c_tile) <= budget_bytes:
            b_tile = cand
            break
    return b_tile, c_tile


def nonlocal_mp(f, params):
    """f: (B, C, n_view) float32, same layout the PyTorch module consumes.
    Returns (B, n_view, C) — identical to the PyTorch forward (eval-mode BN)."""
    (w1, b1, w2, b2, w3, b3, conv_w, conv_b, bn_g, bn_b, bn_m, bn_v) = params
    B, C, V = f.shape

    # Fold Conv2d(2,1,1) + BatchNorm2d(1) (eval) into scale0, scale1, shift and
    # pack every tiny parameter into ONE flat SMEM array.
    bn_scale = bn_g[0] / jnp.sqrt(bn_v[0] + BN_EPS)
    par = jnp.concatenate([
        w1.reshape(-1), b1,
        w2.reshape(-1), b2,
        w3.reshape(-1), b3,
        jnp.stack([conv_w[0] * bn_scale,
                   conv_w[1] * bn_scale,
                   (conv_b[0] - bn_m[0]) * bn_scale + bn_b[0]]),
    ]).astype(jnp.float32)                            # (18,)

    # Channels on lanes: feed the kernel (B, V, C); kernel emits (B, V, C) directly.
    ft = jnp.transpose(f, (0, 2, 1)).astype(jnp.float32)

    b_tile, c_tile = _choose_tiles(B, V, C)
    grid = (pl.cdiv(B, b_tile), pl.cdiv(C, c_tile))

    return pl.pallas_call(
        nonlocal_mp_kernel,
        out_shape=jax.ShapeDtypeStruct((B, V, C), jnp.float32),
        grid=grid,
        in_specs=[
            pl.BlockSpec(memory_space=pltpu.MemorySpace.SMEM),
            pl.BlockSpec((b_tile, V, c_tile), lambda bi, ci: (bi, 0, ci)),
        ],
        out_specs=pl.BlockSpec((b_tile, V, c_tile), lambda bi, ci: (bi, 0, ci)),
        compiler_params=pltpu.CompilerParams(
            dimension_semantics=("parallel", "parallel"),
            vmem_limit_bytes=32 * 1024 * 1024,
        ),
    )(par, ft)


def nonlocal_mp_ref(f, params):
    """Pure-JAX reference mirroring the PyTorch forward (eval-mode BN)."""
    (w1, b1, w2, b2, w3, b3, conv_w, conv_b, bn_g, bn_b, bn_m, bn_v) = params
    B, C, V = f.shape
    F_i = jnp.broadcast_to(f[:, :, None, :], (B, C, V, V))[..., None]  # F[b,c,j]
    F_j = jnp.broadcast_to(f[:, :, :, None], (B, C, V, V))[..., None]  # F[b,c,i]
    M = jnp.concatenate([F_i, F_j], axis=4)                            # (B,C,V,V,2)
    h = _leaky(M @ w1.T + b1)
    h = _leaky(h @ w2.T + b2)
    h = _leaky(h @ jnp.reshape(w3, (1, 2)).T + b3)                     # (B,C,V,V,1)
    Ms = jnp.sum(h, axis=-2)                                           # (B,C,V,1)
    Fc = jnp.concatenate([f[..., None], Ms], axis=-1)                  # (B,C,V,2)
    Fc = jnp.transpose(Fc, (0, 3, 2, 1))                               # (B,2,V,C)
    conv = (conv_w[0] * Fc[:, 0] + conv_w[1] * Fc[:, 1] + conv_b[0])[:, None]
    bn = (conv - bn_m[0]) / jnp.sqrt(bn_v[0] + BN_EPS) * bn_g[0] + bn_b[0]
    return jnp.squeeze(_leaky(bn), axis=1)                             # (B,V,C)


def init_params(key):
    ks = jax.random.split(key, 8)
    w1 = jax.random.normal(ks[0], (2, 2), jnp.float32) * 0.5
    b1 = jax.random.normal(ks[1], (2,), jnp.float32) * 0.1
    w2 = jax.random.normal(ks[2], (2, 2), jnp.float32) * 0.5
    b2 = jax.random.normal(ks[3], (2,), jnp.float32) * 0.1
    w3 = jax.random.normal(ks[4], (2,), jnp.float32) * 0.5     # Linear(2,1) weight, flattened
    b3 = jax.random.normal(ks[5], (1,), jnp.float32) * 0.1
    conv_w = jax.random.normal(ks[6], (2,), jnp.float32) * 0.5  # Conv2d(2,1,1) weight
    conv_b = jax.random.normal(ks[7], (1,), jnp.float32) * 0.1
    # BatchNorm2d(1), eval mode with default running stats.
    bn_g = jnp.ones((1,), jnp.float32)
    bn_b = jnp.zeros((1,), jnp.float32)
    bn_m = jnp.zeros((1,), jnp.float32)
    bn_v = jnp.ones((1,), jnp.float32)
    return (w1, b1, w2, b2, w3, b3, conv_w, conv_b, bn_g, bn_b, bn_m, bn_v)


if __name__ == "__main__":
    B, C, n_view = 2, 4, 8
    key = jax.random.PRNGKey(0)
    k_in, k_par = jax.random.split(key)
    f = jax.random.normal(k_in, (B, C, n_view), jnp.float32)
    params = init_params(k_par)

    out = jax.block_until_ready(nonlocal_mp(f, params))

    ref = nonlocal_mp_ref(f, params)
    assert out.shape == (B, n_view, C), out.shape
    assert jnp.allclose(out, ref, atol=1e-5, rtol=1e-5), \
        float(jnp.max(jnp.abs(out - ref)))
    print("KERNEL_OK")
</pallas_src>

<mosaic_0001>
module attributes {stable_mosaic.version = 11 : i64} {
  func.func @nonlocal_mp_kernel(%arg0: i32, %arg1: i32, %arg2: memref<18xf32, #tpu.memory_space<smem>>, %arg3: memref<2x8x4xf32, #tpu.memory_space<vmem>>, %arg4: memref<2x8x4xf32, #tpu.memory_space<vmem>>) attributes {dimension_semantics = [#tpu.dimension_semantics<parallel>, #tpu.dimension_semantics<parallel>], iteration_bounds = array<i64: 1, 1>, scalar_prefetch = 0 : i64, scratch_operands = 0 : i64, tpu.core_type = #tpu.core_type<tc>, window_params = [{transform_indices = @transform_0, window_bounds = array<i64: 18>}, {transform_indices = @transform_1, window_bounds = array<i64: 2, 8, 4>}, {transform_indices = @transform_2, window_bounds = array<i64: 2, 8, 4>}]} {
    %c0 = arith.constant 0 : index
    %c0_0 = arith.constant 0 : index
    %c0_1 = arith.constant 0 : index
    %0 = vector.load %arg3[%c0, %c0_0, %c0_1] : memref<2x8x4xf32, #tpu.memory_space<vmem>>, vector<2x8x4xf32>
    %c0_2 = arith.constant 0 : index
    %1 = memref.load %arg2[%c0_2] : memref<18xf32, #tpu.memory_space<smem>>
    %c1 = arith.constant 1 : index
    %2 = memref.load %arg2[%c1] : memref<18xf32, #tpu.memory_space<smem>>
    %c2 = arith.constant 2 : index
    %3 = memref.load %arg2[%c2] : memref<18xf32, #tpu.memory_space<smem>>
    %c3 = arith.constant 3 : index
    %4 = memref.load %arg2[%c3] : memref<18xf32, #tpu.memory_space<smem>>
    %c4 = arith.constant 4 : index
    %5 = memref.load %arg2[%c4] : memref<18xf32, #tpu.memory_space<smem>>
    %c5 = arith.constant 5 : index
    %6 = memref.load %arg2[%c5] : memref<18xf32, #tpu.memory_space<smem>>
    %c6 = arith.constant 6 : index
    %7 = memref.load %arg2[%c6] : memref<18xf32, #tpu.memory_space<smem>>
    %c7 = arith.constant 7 : index
    %8 = memref.load %arg2[%c7] : memref<18xf32, #tpu.memory_space<smem>>
    %c8 = arith.constant 8 : index
    %9 = memref.load %arg2[%c8] : memref<18xf32, #tpu.memory_space<smem>>
    %c9 = arith.constant 9 : index
    %10 = memref.load %arg2[%c9] : memref<18xf32, #tpu.memory_space<smem>>
    %c10 = arith.constant 10 : index
    %11 = memref.load %arg2[%c10] : memref<18xf32, #tpu.memory_space<smem>>
    %c11 = arith.constant 11 : index
    %12 = memref.load %arg2[%c11] : memref<18xf32, #tpu.memory_space<smem>>
    %c12 = arith.constant 12 : index
    %13 = memref.load %arg2[%c12] : memref<18xf32, #tpu.memory_space<smem>>
    %c13 = arith.constant 13 : index
    %14 = memref.load %arg2[%c13] : memref<18xf32, #tpu.memory_space<smem>>
    %c14 = arith.constant 14 : index
    %15 = memref.load %arg2[%c14] : memref<18xf32, #tpu.memory_space<smem>>
    %c15 = arith.constant 15 : index
    %16 = memref.load %arg2[%c15] : memref<18xf32, #tpu.memory_space<smem>>
    %c16 = arith.constant 16 : index
    %17 = memref.load %arg2[%c16] : memref<18xf32, #tpu.memory_space<smem>>
    %c17 = arith.constant 17 : index
    %18 = memref.load %arg2[%c17] : memref<18xf32, #tpu.memory_space<smem>>
    %19 = vector.broadcast %1 : f32 to vector<2x8x4xf32>
    %20 = arith.mulf %19, %0 : vector<2x8x4xf32>
    %21 = vector.shape_cast %20 : vector<2x8x4xf32> to vector<2x8x1x4xf32>
    %22 = vector.broadcast %3 : f32 to vector<2x8x4xf32>
    %23 = arith.mulf %22, %0 : vector<2x8x4xf32>
    %24 = vector.shape_cast %23 : vector<2x8x4xf32> to vector<2x8x1x4xf32>
    %25 = vector.broadcast %2 : f32 to vector<2x8x4xf32>
    %26 = arith.mulf %25, %0 : vector<2x8x4xf32>
    %27 = vector.broadcast %5 : f32 to vector<2x8x4xf32>
    %28 = arith.addf %26, %27 : vector<2x8x4xf32>
    %29 = vector.shape_cast %28 : vector<2x8x4xf32> to vector<2x1x8x4xf32>
    %30 = vector.broadcast %4 : f32 to vector<2x8x4xf32>
    %31 = arith.mulf %30, %0 : vector<2x8x4xf32>
    %32 = vector.broadcast %6 : f32 to vector<2x8x4xf32>
    %33 = arith.addf %31, %32 : vector<2x8x4xf32>
    %34 = vector.shape_cast %33 : vector<2x8x4xf32> to vector<2x1x8x4xf32>
    %35 = vector.broadcast %21 : vector<2x8x1x4xf32> to vector<2x8x8x4xf32>
    %36 = vector.broadcast %29 : vector<2x1x8x4xf32> to vector<2x8x8x4xf32>
    %37 = arith.addf %35, %36 : vector<2x8x8x4xf32>
    %cst = arith.constant 2.000000e-01 : f32
    %38 = vector.broadcast %cst : f32 to vector<2x8x8x4xf32>
    %39 = arith.mulf %38, %37 : vector<2x8x8x4xf32>
    %40 = arith.maximumf %37, %39 : vector<2x8x8x4xf32>
    %41 = vector.broadcast %24 : vector<2x8x1x4xf32> to vector<2x8x8x4xf32>
    %42 = vector.broadcast %34 : vector<2x1x8x4xf32> to vector<2x8x8x4xf32>
    %43 = arith.addf %41, %42 : vector<2x8x8x4xf32>
    %cst_3 = arith.constant 2.000000e-01 : f32
    %44 = vector.broadcast %cst_3 : f32 to vector<2x8x8x4xf32>
    %45 = arith.mulf %44, %43 : vector<2x8x8x4xf32>
    %46 = arith.maximumf %43, %45 : vector<2x8x8x4xf32>
    %47 = vector.broadcast %7 : f32 to vector<2x8x8x4xf32>
    %48 = arith.mulf %47, %40 : vector<2x8x8x4xf32>
    %49 = vector.broadcast %8 : f32 to vector<2x8x8x4xf32>
    %50 = arith.mulf %49, %46 : vector<2x8x8x4xf32>
    %51 = arith.addf %48, %50 : vector<2x8x8x4xf32>
    %52 = vector.broadcast %11 : f32 to vector<2x8x8x4xf32>
    %53 = arith.addf %51, %52 : vector<2x8x8x4xf32>
    %cst_4 = arith.constant 2.000000e-01 : f32
    %54 = vector.broadcast %cst_4 : f32 to vector<2x8x8x4xf32>
    %55 = arith.mulf %54, %53 : vector<2x8x8x4xf32>
    %56 = arith.maximumf %53, %55 : vector<2x8x8x4xf32>
    %57 = vector.broadcast %9 : f32 to vector<2x8x8x4xf32>
    %58 = arith.mulf %57, %40 : vector<2x8x8x4xf32>
    %59 = vector.broadcast %10 : f32 to vector<2x8x8x4xf32>
    %60 = arith.mulf %59, %46 : vector<2x8x8x4xf32>
    %61 = arith.addf %58, %60 : vector<2x8x8x4xf32>
    %62 = vector.broadcast %12 : f32 to vector<2x8x8x4xf32>
    %63 = arith.addf %61, %62 : vector<2x8x8x4xf32>
    %cst_5 = arith.constant 2.000000e-01 : f32
    %64 = vector.broadcast %cst_5 : f32 to vector<2x8x8x4xf32>
    %65 = arith.mulf %64, %63 : vector<2x8x8x4xf32>
    %66 = arith.maximumf %63, %65 : vector<2x8x8x4xf32>
    %67 = vector.broadcast %13 : f32 to vector<2x8x8x4xf32>
    %68 = arith.mulf %67, %56 : vector<2x8x8x4xf32>
    %69 = vector.broadcast %14 : f32 to vector<2x8x8x4xf32>
    %70 = arith.mulf %69, %66 : vector<2x8x8x4xf32>
    %71 = arith.addf %68, %70 : vector<2x8x8x4xf32>
    %72 = vector.broadcast %15 : f32 to vector<2x8x8x4xf32>
    %73 = arith.addf %71, %72 : vector<2x8x8x4xf32>
    %cst_6 = arith.constant 2.000000e-01 : f32
    %74 = vector.broadcast %cst_6 : f32 to vector<2x8x8x4xf32>
    %75 = arith.mulf %74, %73 : vector<2x8x8x4xf32>
    %76 = arith.maximumf %73, %75 : vector<2x8x8x4xf32>
    %cst_7 = arith.constant dense<0.000000e+00> : vector<2x8x4xf32>
    %77 = vector.multi_reduction <add>, %76, %cst_7 [1] : vector<2x8x8x4xf32> to vector<2x8x4xf32>
    %78 = vector.broadcast %16 : f32 to vector<2x8x4xf32>
    %79 = arith.mulf %78, %0 : vector<2x8x4xf32>
    %80 = vector.broadcast %17 : f32 to vector<2x8x4xf32>
    %81 = arith.mulf %80, %77 : vector<2x8x4xf32>
    %82 = arith.addf %79, %81 : vector<2x8x4xf32>
    %83 = vector.broadcast %18 : f32 to vector<2x8x4xf32>
    %84 = arith.addf %82, %83 : vector<2x8x4xf32>
    %cst_8 = arith.constant 2.000000e-01 : f32
    %85 = vector.broadcast %cst_8 : f32 to vector<2x8x4xf32>
    %86 = arith.mulf %85, %84 : vector<2x8x4xf32>
    %87 = arith.maximumf %84, %86 : vector<2x8x4xf32>
    %c0_9 = arith.constant 0 : index
    %c0_10 = arith.constant 0 : index
    %c0_11 = arith.constant 0 : index
    %88 = vector.load %arg4[%c0_9, %c0_10, %c0_11] : memref<2x8x4xf32, #tpu.memory_space<vmem>>, vector<2x8x4xf32>
    tpu.vector_store %arg4[%c0_9, %c0_10, %c0_11], %87 {strides = array<i32>} : memref<2x8x4xf32, #tpu.memory_space<vmem>>, vector<2x8x4xf32>,
    return
  }
  func.func @transform_0(%arg0: i32, %arg1: i32) -> i32 {
    %c0_i32 = arith.constant 0 : i32
    %c0_i32_0 = arith.constant 0 : i32
    return %c0_i32 : i32
  }
  func.func @transform_1(%arg0: i32, %arg1: i32) -> (i32, i32, i32) {
    %c0_i32 = arith.constant 0 : i32
    %c0_i32_0 = arith.constant 0 : i32
    return %arg0, %c0_i32, %arg1 : i32, i32, i32
  }
  func.func @transform_2(%arg0: i32, %arg1: i32) -> (i32, i32, i32) {
    %c0_i32 = arith.constant 0 : i32
    %c0_i32_0 = arith.constant 0 : i32
    return %arg0, %c0_i32, %arg1 : i32, i32, i32
  }
}

</mosaic_0001>

<bundles_post_ra>
// kernel: tpu_custom_call.1
= control target key start
LH: loop header
LB: loop body
LE: loop exit
PB: predicated region body
PF: predicated region fallthrough
CT: control target
= control target key end

     0   :  { %7 = vsyncpa [#allocation3], 0  ;;  %s1583_s0 = inlined_call_operand.vmem [shape: f32[18], index: 0, kind: input, shape index: {}]   ;;  %s1584_s1 = inlined_call_operand.vmem [shape: f32[2,8,4], index: 1, kind: input, shape index: {}]   ;;  %s1585_s2 = inlined_call_operand.vmem [shape: f32[2,8,4], index: 2, kind: output, shape index: {}]  }
   0x1   :  { %s14_s11 = sshll.u32 %s1583_s0, 4  ;;  %s15_s11 = int_to_ptr.vmem [resolvable:$true] %s14_s11 }
   0x2   :  { %s889_s12 = scalar_lea.vmem %s15_s11, 16  ;;  %p894_p1 = scmp.lt.s32.totalorder %s15_s11, %s15_s11 }
   0x3   :  { %p890_p0 = scmp.ne.s32.totalorder %s15_s11, %s889_s12  ;;  %p895_p2 = scmp.lt.s32.totalorder %s889_s12, %s889_s12 }
   0x5   :  { %p896_p3 = por %p895_p2, %p894_p1 }
   0x7   :  { %p897_p4 = pnand %p896_p3, %p890_p0 }
   0x9   :  { %900 = shalt.err (!%p897_p4)
}
   0xa   :  { %s903_s13 = smov [#allocation2]  }
   0xb   :  { %17 = dma.vmem_to_smem %s15_s11, 16, %s903_s13, [#allocation3]  }
   0xc   :  { %901 = dma.done.wait [#allocation3], 16  }
   0xd   :  { %902 = vsyncadd [#allocation3], 4294967280 }
   0xe   :  { %23 = sfence }
   0xf   :  { %s26_s14 = sld [smem:[#allocation2]]  ;;  %v53_v0 = vlaneseq  ;;  %v904_v1 = vmov 1966171168   ;;  %v926_v5 = vld [vmem:[%s1584_s1] sm:$0xff]  ;;  %v931_v6 = vld [vmem:[%s1584_s1 + $0x8] sm:$0xff]  ;;  %vm815_vm0 = vcmask 31744  }
  0x10   :  { %v51_v2 = vunpack.c.l.s4 %v904_v1  ;;  %s869_s15 = sld [smem:[#allocation2 + $0x2]] }
  0x11   :  { %v54_v3 = vshrl.u32 %v53_v0, 7  ;;  %s868_s19 = sld [smem:[#allocation2 + $0x1]] }
  0x12   :  { %v52_v4 = vunpack.c.0.s8 %v51_v2  ;;  %s935_s20 = sld [smem:[#allocation2 + $0x3]] }
  0x13   :  { %s939_s21 = sld [smem:[#allocation2 + $0x4]]  ;;  %v951_v26 = vsub.s32 0, %v54_v3 }
  0x14   :  { %v933_v7 = vsub.s32 %v52_v4, %v54_v3  ;;  %s961_s22 = sld [smem:[#allocation2 + $0x5]] }
  0x15   :  { %v44_v8 = vstv %s26_s14  ;;  %s1129_s23 = sld [smem:[#allocation2 + $0x6]] }
  0x16   :  { %v45_v9 = vmul.f32 %v44_v8, %v926_v5  ;;  %v46_v10 = vmul.f32 %v44_v8, %v931_v6  ;;  %v147_v11 = vstv %s869_s15  ;;  %s1146_s24 = sld [smem:[#allocation2 + $0x7]] }
  0x17   :  { %v148_v16 = vmul.f32 %v147_v11, %v926_v5  ;;  %v250_v20 = vstv %s868_s19  ;;  %v149_v24 = vmul.f32 %v147_v11, %v931_v6  ;;  %s1161_s25 = sld [smem:[#allocation2 + $0xa]] }
  0x18   :  { %v49_v12 = vcombine.high %v45_v9, %v45_v9  ;;  %v56_v13 = vrot.slane %v45_v9, %v933_v7  ;;  %v98_v14 = vcombine.high %v46_v10, %v46_v10  ;;  %v105_v15 = vrot.slane %v46_v10, %v933_v7  ;;  %s1169_s26 = sld [smem:[#allocation2 + $0x8]] }
  0x19   :  { %v152_v19 = vcombine.high %v148_v16, %v148_v16  ;;  %v159_v25 = vrot.slane %v148_v16, %v933_v7  ;;  %v251_v30 = vmul.f32 %v250_v20, %v926_v5  ;;  %v252_v32 = vmul.f32 %v250_v20, %v931_v6  ;;  %s1234_s27 = sld [smem:[#allocation2 + $0x9]] }
  0x1a   :  { %v63_v17 = vrot.slane %v49_v12, %v933_v7  ;;  %v112_v18 = vrot.slane %v98_v14, %v933_v7  ;;  %v64_v21 = vcombine.high %v56_v13, %v56_v13  ;;  %v947_v22 = vrot.slane %v56_v13, %v933_v7  ;;  %s1355_s28 = sld [smem:[#allocation2 + $0xb]] }
  0x1b   :  { %v113_v23 = vcombine.high %v105_v15, %v105_v15  ;;  %v954_v28 = vrot.slane %v105_v15, %v933_v7  ;;  %v166_v29 = vrot.slane %v152_v19, %v933_v7  ;;  %v253_v33 = vstv %s939_s21  ;;  %s1381_s29 = sld [smem:[#allocation2 + $0xc]] }
  0x1c   :  { %v65_v27 = vcombine.high %v63_v17, %v63_v17  ;;  %v114_v31 = vcombine.high %v112_v18, %v112_v18  ;;  %v256_v34 = vstv %s935_s20  ;;  %v964_v35 = vrot.slane %v63_v17, %v933_v7  ;;  %s1388_s30 = sld [smem:[#allocation2 + $0xd]] }
  0x1d   :  { %v86_v36 = vrot.slane %v64_v21, %v933_v7  ;;  %v94_v37 = vcombine.high %v947_v22, %v947_v22  ;;  %v970_v38 = vrot.slane %v112_v18, %v933_v7  ;;  %v973_v39 = vrot.slane %v113_v23, %v933_v7  ;;  %s1404_s3 = sld [smem:[#allocation2 + $0xe]] }
  0x1e   :  { %v167_v40 = vcombine.high %v159_v25, %v159_v25  ;;  %v201_v41 = vcombine.high %v149_v24, %v149_v24  ;;  %v208_v42 = vrot.slane %v149_v24, %v933_v7  ;;  %v93_v43 = vrot.slane %v65_v27, %v933_v7  ;;  %s1550_s4 = sld [smem:[#allocation2 + $0xf]] }
  0x1f   :  { %v143_v44 = vcombine.high %v954_v28, %v954_v28  ;;  %v168_v45 = vcombine.high %v166_v29, %v166_v29  ;;  %v980_v46 = vrot.slane %v159_v25, %v933_v7  ;;  %v95_v47 = vcombine.high %v964_v35, %v964_v35  ;;  %s1556_s5 = sld [smem:[#allocation2 + $0x10]] }
  0x20   :  { %v96_v48 = vcombine.high %v86_v36, %v86_v36  ;;  %v142_v49 = vrot.slane %v114_v31, %v933_v7  ;;  %v215_v50 = vrot.slane %v201_v41, %v933_v7  ;;  %v144_v51 = vcombine.high %v970_v38, %v970_v38  ;;  %s884_s6 = sld [smem:[#allocation2 + $0x11]] }
  0x21   :  { %v145_v52 = vcombine.high %v973_v39, %v973_v39  ;;  %v991_v53 = vrot.slane %v166_v29, %v933_v7  ;;  %v216_v54 = vcombine.high %v208_v42, %v208_v42  ;;  %v97_v55 = vcombine.high %v93_v43, %v93_v43 }
  0x22   :  { %v146_v56 = vcombine.high %v142_v49, %v142_v49  ;;  %v994_v57 = vrot.slane %v167_v40, %v933_v7  ;;  %v997_v58 = vrot.slane %v208_v42, %v933_v7  ;;  %v1000_v59 = vrot.slane %v168_v45, %v933_v7 }
  0x23   :  { %v197_v60 = vcombine.high %v980_v46, %v980_v46  ;;  %v198_v61 = vcombine.high %v991_v53, %v991_v53  ;;  %v217_v62 = vcombine.high %v215_v50, %v215_v50  ;;  %v254_v0 = vadd.f32 %v253_v33, %v251_v30 }
  0x24   :  { %v199_v63 = vcombine.high %v994_v57, %v994_v57  ;;  %v257_v1 = vmul.f32 %v256_v34, %v926_v5  ;;  %v258_v2 = vmul.f32 %v256_v34, %v931_v6  ;;  %v200_v3 = vcombine.high %v1000_v59, %v1000_v59 }
  0x25   :  { %v1013_v4 = vrot.slane %v215_v50, %v933_v7  ;;  %v1016_v8 = vrot.slane %v216_v54, %v933_v7  ;;  %v259_v9 = vstv %s961_s22  ;;  %v246_v10 = vcombine.high %v997_v58, %v997_v58 }
  0x26   :  { %v255_v11 = vadd.f32 %v253_v33, %v252_v32  ;;  %v265_v12 = vrot.slane %v947_v22, %v951_v26  ;;  %v269_v5 = vrot.slane %v86_v36, %v951_v26  ;;  %v1025_v6 = vrot.slane %v217_v62, %v933_v7 }
  0x27   :  { %v247_v13 = vcombine.high %v1013_v4, %v1013_v4  ;;  %v248_v14 = vcombine.high %v1016_v8, %v1016_v8  ;;  %v273_v15 = vrot.slane %v94_v37, %v951_v26  ;;  %v1032_v16 = vadd.f32 %v259_v9, %v257_v1 }
  0x28   :  { %v1034_v17 = vadd.f32 %v259_v9, %v258_v2  ;;  %v277_v18 = vrot.slane %v96_v48, %v951_v26  ;;  %v281_v19 = vrot.slane %v964_v35, %v951_v26  ;;  %v285_v7 = vrot.slane %v93_v43, %v951_v26 }
  0x29   :  { %v289_v20 = vrot.slane %v95_v47, %v951_v26  ;;  %v293_v21 = vrot.slane %v97_v55, %v951_v26  ;;  %v297_v22 = vrot.slane %v954_v28, %v951_v26  ;;  %v301_v23 = vrot.slane %v973_v39, %v951_v26 }
  0x2a   :  { %v305_v24 = vrot.slane %v143_v44, %v951_v26  ;;  %v309_v25 = vrot.slane %v145_v52, %v951_v26  ;;  %v313_v27 = vrot.slane %v970_v38, %v951_v26  ;;  %v317_v29 = vrot.slane %v142_v49, %v951_v26 }
  0x2b   :  { %v321_v30 = vrot.slane %v144_v51, %v951_v26  ;;  %v342_v31 = vadd.f32 %v265_v12, %v254_v0  ;;  %v343_v32 = vadd.f32 %v269_v5, %v254_v0  ;;  %v325_v33 = vrot.slane %v146_v56, %v951_v26 }
  0x2c   :  { %v344_v34 = vadd.f32 %v273_v15, %v254_v0  ;;  %v345_v28 = vadd.f32 %v277_v18, %v254_v0  ;;  %v346_v35 = vadd.f32 %v281_v19, %v254_v0  ;;  %v347_v36 = vadd.f32 %v285_v7, %v254_v0 }
  0x2d   :  { %v348_v37 = vadd.f32 %v289_v20, %v254_v0  ;;  %v349_v39 = vadd.f32 %v293_v21, %v254_v0  ;;  %v350_v40 = vadd.f32 %v297_v22, %v255_v11  ;;  %v351_v41 = vadd.f32 %v301_v23, %v255_v11 }
  0x2e   :  { %v352_v42 = vadd.f32 %v305_v24, %v255_v11  ;;  %v353_v43 = vadd.f32 %v309_v25, %v255_v11  ;;  %v354_v44 = vadd.f32 %v313_v27, %v255_v11  ;;  %v355_v38 = vadd.f32 %v317_v29, %v255_v11 }
  0x2f   :  { %v1053_v45 = vadd.f32 %v321_v30, %v255_v11  ;;  %v358_v47 = vmul.f32 0.2, %v342_v31  ;;  %v359_v48 = vmul.f32 0.2, %v343_v32  ;;  %v1055_v49 = vadd.f32 %v325_v33, %v255_v11 }
  0x30   :  { %v360_v50 = vmul.f32 0.2, %v344_v34  ;;  %v361_v51 = vmul.f32 0.2, %v345_v28  ;;  %v362_v52 = vmul.f32 0.2, %v346_v35  ;;  %v249_v54 = vcombine.high %v1025_v6, %v1025_v6 }
  0x31   :  { %v363_v55 = vmul.f32 0.2, %v347_v36  ;;  %v364_v56 = vmul.f32 0.2, %v348_v37  ;;  %v365_v62 = vmul.f32 0.2, %v349_v39  ;;  %v393_v9 = vrot.slane %v980_v46, %v951_v26 }
  0x32   :  { %v366_v0 = vmul.f32 0.2, %v350_v40  ;;  %v367_v1 = vmul.f32 0.2, %v351_v41  ;;  %v368_v2 = vmul.f32 0.2, %v352_v42  ;;  %v1061_v15 = vmax.f32 %v342_v31, %v358_v47 }
  0x33   :  { %v369_v12 = vmul.f32 0.2, %v353_v43  ;;  %v370_v5 = vmul.f32 0.2, %v354_v44  ;;  %v1063_v11 = vmax.f32 %v343_v32, %v359_v48  ;;  %v371_v18 = vmul.f32 0.2, %v355_v38 }
  0x34   :  { %v372_v19 = vmul.f32 0.2, %v1053_v45  ;;  %v373_v7 = vmul.f32 0.2, %v1055_v49  ;;  %v1067_v20 = vmax.f32 %v344_v34, %v360_v50  ;;  %v1069_v21 = vmax.f32 %v345_v28, %v361_v51 }
  0x35   :  { %v1071_v22 = vmax.f32 %v346_v35, %v362_v52  ;;  %v1073_v23 = vmax.f32 %v347_v36, %v363_v55  ;;  %v1075_v24 = vmax.f32 %v348_v37, %v364_v56  ;;  %v1077_v25 = vmax.f32 %v349_v39, %v365_v62 }
  0x36   :  { %v1079_v27 = vmax.f32 %v350_v40, %v366_v0  ;;  %v1081_v29 = vmax.f32 %v351_v41, %v367_v1  ;;  %v1083_v30 = vmax.f32 %v352_v42, %v368_v2  ;;  %v1085_v31 = vmax.f32 %v353_v43, %v369_v12 }
  0x37   :  { %v1087_v32 = vmax.f32 %v354_v44, %v370_v5  ;;  %v397_v33 = vrot.slane %v994_v57, %v951_v26  ;;  %v401_v34 = vrot.slane %v197_v60, %v951_v26  ;;  %v1095_v28 = vmax.f32 %v355_v38, %v371_v18 }
  0x38   :  { %v405_v35 = vrot.slane %v199_v63, %v951_v26  ;;  %v409_v36 = vrot.slane %v991_v53, %v951_v26  ;;  %v413_v37 = vrot.slane %v1000_v59, %v951_v26  ;;  %v417_v39 = vrot.slane %v198_v61, %v951_v26 }
  0x39   :  { %1622 = vst [vmem:[#allocation5_spill] sm:$0xff] %v1087_v32  ;;  %1623 = vst [vmem:[#allocation6_spill] sm:$0xff] %v1095_v28  ;;  %v421_v46 = vrot.slane %v200_v3, %v951_v26  ;;  %v425_v57 = vrot.slane %v997_v58, %v951_v26  ;;  %v429_v60 = vrot.slane %v1016_v8, %v951_v26 }
  0x3a   :  { %v433_v63 = vrot.slane %v246_v10, %v951_v26  ;;  %v437_v53 = vrot.slane %v248_v14, %v951_v26  ;;  %v441_v59 = vrot.slane %v1013_v4, %v951_v26  ;;  %v445_v61 = vrot.slane %v1025_v6, %v951_v26 }
  0x3b   :  { %v449_v3 = vrot.slane %v247_v13, %v951_v26  ;;  %v470_v58 = vadd.f32 %v393_v9, %v1032_v16  ;;  %v471_v10 = vadd.f32 %v397_v33, %v1032_v16  ;;  %v472_v8 = vadd.f32 %v401_v34, %v1032_v16 }
  0x3c   :  { %v453_v14 = vrot.slane %v249_v54, %v951_v26  ;;  %v473_v40 = vadd.f32 %v405_v35, %v1032_v16  ;;  %v474_v41 = vadd.f32 %v409_v36, %v1032_v16  ;;  %v475_v6 = vadd.f32 %v413_v37, %v1032_v16 }
  0x3d   :  { %v476_v42 = vadd.f32 %v417_v39, %v1032_v16  ;;  %v477_v43 = vadd.f32 %v421_v46, %v1032_v16  ;;  %v478_v4 = vadd.f32 %v425_v57, %v1034_v17  ;;  %v479_v13 = vadd.f32 %v429_v60, %v1034_v17 }
  0x3e   :  { %v480_v44 = vadd.f32 %v433_v63, %v1034_v17  ;;  %v481_v26 = vadd.f32 %v437_v53, %v1034_v17  ;;  %v482_v38 = vadd.f32 %v441_v59, %v1034_v17  ;;  %v483_v47 = vadd.f32 %v445_v61, %v1034_v17 }
  0x3f   :  { %v484_v48 = vadd.f32 %v449_v3, %v1034_v17  ;;  %v486_v50 = vmul.f32 0.2, %v470_v58  ;;  %v487_v51 = vmul.f32 0.2, %v471_v10  ;;  %v488_v52 = vmul.f32 0.2, %v472_v8 }
  0x40   :  { %v485_v16 = vadd.f32 %v453_v14, %v1034_v17  ;;  %v489_v54 = vmul.f32 0.2, %v473_v40  ;;  %v490_v55 = vmul.f32 0.2, %v474_v41  ;;  %v491_v56 = vmul.f32 0.2, %v475_v6 }
  0x41   :  { %v1155_v62 = vmax.f32 %v1053_v45, %v372_v19  ;;  %v492_v0 = vmul.f32 0.2, %v476_v42  ;;  %v493_v1 = vmul.f32 0.2, %v477_v43  ;;  %v494_v2 = vmul.f32 0.2, %v478_v4 }
  0x42   :  { %v1158_v9 = vmax.f32 %v1055_v49, %v373_v7  ;;  %v495_v12 = vmul.f32 0.2, %v479_v13  ;;  %v496_v5 = vmul.f32 0.2, %v480_v44  ;;  %v497_v18 = vmul.f32 0.2, %v481_v26 }
  0x43   :  { %1624 = vst [vmem:[#allocation7_spill] sm:$0xff] %v1155_v62  ;;  %v498_v33 = vmul.f32 0.2, %v482_v38  ;;  %v499_v34 = vmul.f32 0.2, %v483_v47  ;;  %v518_v36 = vstv %s1129_s23  ;;  %v1163_v37 = vmax.f32 %v470_v58, %v486_v50 }
  0x44   :  { %1625 = vst [vmem:[#allocation8_spill] sm:$0xff] %v1158_v9  ;;  %v500_v35 = vmul.f32 0.2, %v484_v48  ;;  %v501_v17 = vmul.f32 0.2, %v485_v16  ;;  %v1165_v45 = vmax.f32 %v471_v10, %v487_v51  ;;  %v1167_v19 = vmax.f32 %v472_v8, %v488_v52 }
  0x45   :  { %1626 = vst [vmem:[#allocation9_spill] sm:$0xff] %v1163_v37  ;;  %v1171_v49 = vmax.f32 %v473_v40, %v489_v54  ;;  %v1173_v7 = vmax.f32 %v474_v41, %v490_v55  ;;  %v1175_v39 = vmax.f32 %v475_v6, %v491_v56  ;;  %v1177_v46 = vmax.f32 %v476_v42, %v492_v0 }
  0x46   :  { %1627 = vst [vmem:[#allocation10_spill] sm:$0xff] %v1165_v45  ;;  %1628 = vst [vmem:[#allocation11_spill] sm:$0xff] %v1167_v19  ;;  %v1179_v57 = vmax.f32 %v477_v43, %v493_v1  ;;  %v1181_v60 = vmax.f32 %v478_v4, %v494_v2  ;;  %v1183_v63 = vmax.f32 %v479_v13, %v495_v12  ;;  %v535_v43 = vstv %s1146_s24 }
  0x47   :  { %1629 = vst [vmem:[#allocation12_spill] sm:$0xff] %v1171_v49  ;;  %1630 = vst [vmem:[#allocation13_spill] sm:$0xff] %v1173_v7  ;;  %v1185_v53 = vmax.f32 %v480_v44, %v496_v5  ;;  %v1187_v59 = vmax.f32 %v481_v26, %v497_v18  ;;  %v1189_v61 = vmax.f32 %v482_v38, %v498_v33  ;;  %v568_v54 = vstv %s1161_s25 }
  0x48   :  { %1631 = vst [vmem:[#allocation14_spill] sm:$0xff] %v1175_v39  ;;  %1632 = vst [vmem:[#allocation15_spill] sm:$0xff] %v1177_v46  ;;  %v1191_v3 = vmax.f32 %v483_v47, %v499_v34  ;;  %v1193_v58 = vmax.f32 %v484_v48, %v500_v35  ;;  %v1195_v10 = vmax.f32 %v485_v16, %v501_v17  ;;  %v1220_v1 = vstv %s1169_s26 }
  0x49   :  { %1633 = vst [vmem:[#allocation16_spill] sm:$0xff] %v1179_v57  ;;  %1634 = vst [vmem:[#allocation17_spill] sm:$0xff] %v1181_v60  ;;  %v519_v8 = vmul.f32 %v518_v36, %v1061_v15  ;;  %v520_v14 = vmul.f32 %v518_v36, %v1063_v11  ;;  %v521_v40 = vmul.f32 %v518_v36, %v1067_v20 }
  0x4a   :  { %1635 = vst [vmem:[#allocation18_spill] sm:$0xff] %v1183_v63  ;;  %1636 = vst [vmem:[#allocation19_spill] sm:$0xff] %v1185_v53  ;;  %v522_v41 = vmul.f32 %v518_v36, %v1069_v21  ;;  %v523_v6 = vmul.f32 %v518_v36, %v1071_v22  ;;  %v524_v42 = vmul.f32 %v518_v36, %v1073_v23 }
  0x4b   :  { %1637 = vst [vmem:[#allocation20_spill] sm:$0xff] %v1187_v59  ;;  %1638 = vst [vmem:[#allocation21_spill] sm:$0xff] %v1189_v61  ;;  %v525_v4 = vmul.f32 %v518_v36, %v1075_v24  ;;  %v526_v13 = vmul.f32 %v518_v36, %v1077_v25  ;;  %v527_v44 = vmul.f32 %v518_v36, %v1079_v27 }
  0x4c   :  { %1639 = vst [vmem:[#allocation22_spill] sm:$0xff] %v1191_v3  ;;  %1640 = vst [vmem:[#allocation23_spill] sm:$0xff] %v1193_v58  ;;  %v528_v26 = vmul.f32 %v518_v36, %v1081_v29  ;;  %v529_v38 = vmul.f32 %v518_v36, %v1083_v30  ;;  %v530_v47 = vmul.f32 %v518_v36, %v1085_v31 }
  0x4d   :  { %v531_v48 = vmul.f32 %v518_v36, %v1087_v32  ;;  %v532_v50 = vmul.f32 %v518_v36, %v1095_v28  ;;  %v533_v51 = vmul.f32 %v518_v36, %v1155_v62  ;;  %v534_v52 = vmul.f32 %v518_v36, %v1158_v9 }
  0x4e   :  { %v536_v16 = vmul.f32 %v535_v43, %v1163_v37  ;;  %v537_v55 = vmul.f32 %v535_v43, %v1165_v45  ;;  %v538_v56 = vmul.f32 %v535_v43, %v1167_v19  ;;  %v539_v0 = vmul.f32 %v535_v43, %v1171_v49 }
  0x4f   :  { %v540_v2 = vmul.f32 %v535_v43, %v1173_v7  ;;  %v541_v12 = vmul.f32 %v535_v43, %v1175_v39  ;;  %v542_v5 = vmul.f32 %v535_v43, %v1177_v46  ;;  %v543_v18 = vmul.f32 %v535_v43, %v1179_v57 }
  0x50   :  { %v544_v33 = vmul.f32 %v535_v43, %v1181_v60  ;;  %v545_v34 = vmul.f32 %v535_v43, %v1183_v63  ;;  %v546_v35 = vmul.f32 %v535_v43, %v1185_v53  ;;  %v547_v36 = vmul.f32 %v535_v43, %v1187_v59 }
  0x51   :  { %v548_v17 = vmul.f32 %v535_v43, %v1189_v61  ;;  %v549_v49 = vmul.f32 %v535_v43, %v1191_v3  ;;  %v550_v7 = vmul.f32 %v535_v43, %v1193_v58  ;;  %v552_v19 = vadd.f32 %v536_v16, %v519_v8  ;;  %v1666_v16 = vld [vmem:[#allocation13_spill] sm:$0xff] }
  0x52   :  { %v551_v39 = vmul.f32 %v535_v43, %v1195_v10  ;;  %v553_v46 = vadd.f32 %v537_v55, %v520_v14  ;;  %v554_v45 = vadd.f32 %v538_v56, %v521_v40  ;;  %v555_v57 = vadd.f32 %v539_v0, %v522_v41  ;;  %v1662_v0 = vld [vmem:[#allocation9_spill] sm:$0xff] }
  0x53   :  { %v556_v60 = vadd.f32 %v540_v2, %v523_v6  ;;  %v557_v63 = vadd.f32 %v541_v12, %v524_v42  ;;  %v558_v37 = vadd.f32 %v542_v5, %v525_v4  ;;  %v559_v53 = vadd.f32 %v543_v18, %v526_v13  ;;  %v1658_v5 = vld [vmem:[#allocation5_spill] sm:$0xff]  ;;  %v1659_v12 = vld [vmem:[#allocation6_spill] sm:$0xff]  ;;  %v1660_v2 = vld [vmem:[#allocation7_spill] sm:$0xff] }
  0x54   :  { %v560_v9 = vadd.f32 %v544_v33, %v527_v44  ;;  %v561_v59 = vadd.f32 %v545_v34, %v528_v26  ;;  %v562_v62 = vadd.f32 %v546_v35, %v529_v38  ;;  %v563_v61 = vadd.f32 %v547_v36, %v530_v47 }
  0x55   :  { %v564_v28 = vadd.f32 %v548_v17, %v531_v48  ;;  %v565_v3 = vadd.f32 %v549_v49, %v532_v50  ;;  %v566_v32 = vadd.f32 %v550_v7, %v533_v51  ;;  %v1236_v58 = vadd.f32 %v568_v54, %v552_v19 }
  0x56   :  { %v567_v8 = vadd.f32 %v551_v39, %v534_v52  ;;  %v1238_v43 = vadd.f32 %v568_v54, %v553_v46  ;;  %v1240_v14 = vadd.f32 %v568_v54, %v554_v45  ;;  %v1242_v40 = vadd.f32 %v568_v54, %v555_v57  ;;  %v1667_v52 = vld [vmem:[#allocation14_spill] sm:$0xff] }
  0x57   :  { %v1244_v41 = vadd.f32 %v568_v54, %v556_v60  ;;  %v1246_v6 = vadd.f32 %v568_v54, %v557_v63  ;;  %v1248_v42 = vadd.f32 %v568_v54, %v558_v37  ;;  %v1250_v4 = vadd.f32 %v568_v54, %v559_v53 }
  0x58   :  { %v1252_v49 = vadd.f32 %v568_v54, %v560_v9  ;;  %v1254_v19 = vadd.f32 %v568_v54, %v561_v59  ;;  %v1256_v7 = vadd.f32 %v568_v54, %v562_v62  ;;  %v1258_v39 = vadd.f32 %v568_v54, %v563_v61 }
  0x59   :  { %v1260_v45 = vadd.f32 %v568_v54, %v564_v28  ;;  %v1262_v46 = vadd.f32 %v568_v54, %v565_v3  ;;  %v1264_v57 = vadd.f32 %v568_v54, %v566_v32  ;;  %v1267_v37 = vmul.f32 0.2, %v1236_v58 }
  0x5a   :  { %1641 = vst [vmem:[#allocation24_spill] sm:$0xff] %v1252_v49  ;;  %1642 = vst [vmem:[#allocation25_spill] sm:$0xff] %v1254_v19  ;;  %v1269_v60 = vadd.f32 %v568_v54, %v567_v8  ;;  %v1272_v9 = vmul.f32 0.2, %v1238_v43  ;;  %v1275_v63 = vmul.f32 0.2, %v1240_v14  ;;  %v634_v59 = vstv %s1234_s27 }
  0x5b   :  { %1643 = vst [vmem:[#allocation26_spill] sm:$0xff] %v1256_v7  ;;  %1644 = vst [vmem:[#allocation27_spill] sm:$0xff] %v1258_v39  ;;  %v1278_v62 = vmul.f32 0.2, %v1242_v40  ;;  %v1281_v28 = vmul.f32 0.2, %v1244_v41  ;;  %v618_v44 = vmul.f32 %v1220_v1, %v1061_v15  ;;  %v619_v48 = vmul.f32 %v1220_v1, %v1063_v11 }
  0x5c   :  { %1645 = vst [vmem:[#allocation28_spill] sm:$0xff] %v1260_v45  ;;  %1646 = vst [vmem:[#allocation29_spill] sm:$0xff] %v1262_v46  ;;  %v1284_v32 = vmul.f32 0.2, %v1246_v6  ;;  %v1287_v53 = vmul.f32 0.2, %v1248_v42  ;;  %v620_v8 = vmul.f32 %v1220_v1, %v1067_v20  ;;  %v621_v33 = vmul.f32 %v1220_v1, %v1069_v21 }
  0x5d   :  { %1647 = vst [vmem:[#allocation30_spill] sm:$0xff] %v1264_v57  ;;  %1648 = vst [vmem:[#allocation31_spill] sm:$0xff] %v1269_v60  ;;  %v1291_v61 = vmul.f32 0.2, %v1250_v4  ;;  %v1294_v3 = vmul.f32 0.2, %v1252_v49  ;;  %v622_v34 = vmul.f32 %v1220_v1, %v1071_v22  ;;  %v623_v35 = vmul.f32 %v1220_v1, %v1073_v23 }
  0x5e   :  { %v1297_v13 = vmul.f32 0.2, %v1254_v19  ;;  %v1302_v26 = vmul.f32 0.2, %v1256_v7  ;;  %v1305_v38 = vmul.f32 0.2, %v1258_v39  ;;  %v624_v36 = vmul.f32 %v1220_v1, %v1075_v24 }
  0x5f   :  { %1649 = vst [vmem:[#allocation32_spill] sm:$0xff] %v1291_v61  ;;  %1650 = vst [vmem:[#allocation33_spill] sm:$0xff] %v1294_v3  ;;  %v1308_v47 = vmul.f32 0.2, %v1260_v45  ;;  %v1313_v50 = vmul.f32 0.2, %v1262_v46  ;;  %v625_v17 = vmul.f32 %v1220_v1, %v1077_v25  ;;  %v626_v20 = vmul.f32 %v1220_v1, %v1079_v27 }
  0x60   :  { %1651 = vst [vmem:[#allocation34_spill] sm:$0xff] %v1297_v13  ;;  %1652 = vst [vmem:[#allocation35_spill] sm:$0xff] %v1302_v26  ;;  %v1316_v51 = vmul.f32 0.2, %v1264_v57  ;;  %v1319_v15 = vmul.f32 0.2, %v1269_v60  ;;  %v627_v18 = vmul.f32 %v1220_v1, %v1081_v29  ;;  %v628_v21 = vmul.f32 %v1220_v1, %v1083_v30 }
  0x61   :  { %1653 = vst [vmem:[#allocation36_spill] sm:$0xff] %v1305_v38  ;;  %1654 = vst [vmem:[#allocation37_spill] sm:$0xff] %v1308_v47  ;;  %v629_v22 = vmul.f32 %v1220_v1, %v1085_v31  ;;  %v630_v23 = vmul.f32 %v1220_v1, %v1658_v5  ;;  %v631_v24 = vmul.f32 %v1220_v1, %v1659_v12  ;;  %v1661_v27 = vld [vmem:[#allocation8_spill] sm:$0xff]  ;;  %v1663_v30 = vld [vmem:[#allocation10_spill] sm:$0xff] }
  0x62   :  { %1655 = vst [vmem:[#allocation38_spill] sm:$0xff] %v1313_v50  ;;  %1656 = vst [vmem:[#allocation39_spill] sm:$0xff] %v1316_v51  ;;  %v632_v25 = vmul.f32 %v1220_v1, %v1660_v2  ;;  %v633_v29 = vmul.f32 %v1220_v1, %v1661_v27  ;;  %v635_v56 = vmul.f32 %v634_v59, %v1662_v0  ;;  %v1664_v11 = vld [vmem:[#allocation11_spill] sm:$0xff]  ;;  %v1665_v5 = vld [vmem:[#allocation12_spill] sm:$0xff] }
  0x63   :  { %1657 = vst [vmem:[#allocation40_spill] sm:$0xff] %v1319_v15  ;;  %v636_v55 = vmul.f32 %v634_v59, %v1663_v30  ;;  %v637_v31 = vmul.f32 %v634_v59, %v1664_v11  ;;  %v638_v54 = vmul.f32 %v634_v59, %v1665_v5  ;;  %v639_v12 = vmul.f32 %v634_v59, %v1666_v16  ;;  %v1668_v2 = vld [vmem:[#allocation15_spill] sm:$0xff]  ;;  %v1669_v51 = vld [vmem:[#allocation16_spill] sm:$0xff]  ;;  %v1670_v1 = vld [vmem:[#allocation17_spill] sm:$0xff] }
  0x64   :  { %v640_v15 = vmul.f32 %v634_v59, %v1667_v52  ;;  %v641_v60 = vmul.f32 %v634_v59, %v1668_v2  ;;  %v642_v57 = vmul.f32 %v634_v59, %v1669_v51  ;;  %v643_v27 = vmul.f32 %v634_v59, %v1670_v1  ;;  %v1671_v0 = vld [vmem:[#allocation18_spill] sm:$0xff]  ;;  %v1672_v30 = vld [vmem:[#allocation19_spill] sm:$0xff]  ;;  %v1673_v11 = vld [vmem:[#allocation20_spill] sm:$0xff] }
  0x65   :  { %v644_v50 = vmul.f32 %v634_v59, %v1671_v0  ;;  %v645_v46 = vmul.f32 %v634_v59, %v1672_v30  ;;  %v646_v47 = vmul.f32 %v634_v59, %v1673_v11  ;;  %v1674_v45 = vld [vmem:[#allocation21_spill] sm:$0xff]  ;;  %v1675_v5 = vld [vmem:[#allocation22_spill] sm:$0xff]  ;;  %v1676_v16 = vld [vmem:[#allocation23_spill] sm:$0xff]  ;;  %v650_v52 = vmul.f32 %v634_v59, %v1195_v10 }
  0x66   :  { %v647_v38 = vmul.f32 %v634_v59, %v1674_v45  ;;  %v648_v39 = vmul.f32 %v634_v59, %v1675_v5  ;;  %v649_v26 = vmul.f32 %v634_v59, %v1676_v16  ;;  %v651_v2 = vadd.f32 %v635_v56, %v618_v44 }
  0x67   :  { %v652_v7 = vadd.f32 %v636_v55, %v619_v48  ;;  %v653_v13 = vadd.f32 %v637_v31, %v620_v8  ;;  %v654_v51 = vadd.f32 %v638_v54, %v621_v33  ;;  %v655_v1 = vadd.f32 %v639_v12, %v622_v34 }
  0x68   :  { %v656_v19 = vadd.f32 %v640_v15, %v623_v35  ;;  %v667_v0 = vstv %s1355_s28  ;;  %v657_v30 = vadd.f32 %v641_v60, %v624_v36  ;;  %v658_v11 = vadd.f32 %v642_v57, %v625_v17 }
  0x69   :  { %v659_v45 = vadd.f32 %v643_v27, %v626_v20  ;;  %v660_v3 = vadd.f32 %v644_v50, %v627_v18  ;;  %v661_v5 = vadd.f32 %v645_v46, %v628_v21  ;;  %v662_v49 = vadd.f32 %v646_v47, %v629_v22 }
  0x6a   :  { %v663_v16 = vadd.f32 %v647_v38, %v630_v23  ;;  %v664_v61 = vadd.f32 %v648_v39, %v631_v24  ;;  %v665_v10 = vadd.f32 %v649_v26, %v632_v25  ;;  %v666_v59 = vadd.f32 %v650_v52, %v633_v29 }
  0x6b   :  { %v668_v44 = vadd.f32 %v667_v0, %v651_v2  ;;  %v1407_v48 = vstv %s1381_s29  ;;  %v669_v54 = vadd.f32 %v667_v0, %v652_v7  ;;  %v670_v55 = vadd.f32 %v667_v0, %v653_v13 }
  0x6c   :  { %v671_v15 = vadd.f32 %v667_v0, %v654_v51  ;;  %v1410_v56 = vstv %s1388_s30  ;;  %v1412_v33 = vadd.f32 %v667_v0, %v655_v1  ;;  %v1414_v60 = vadd.f32 %v667_v0, %v656_v19 }
  0x6d   :  { %v1416_v57 = vadd.f32 %v667_v0, %v657_v30  ;;  %v1418_v46 = vadd.f32 %v667_v0, %v658_v11  ;;  %v676_v39 = vadd.f32 %v667_v0, %v659_v45  ;;  %v677_v26 = vadd.f32 %v667_v0, %v660_v3 }
  0x6e   :  { %v678_v38 = vadd.f32 %v667_v0, %v661_v5  ;;  %v1420_v47 = vadd.f32 %v667_v0, %v662_v49  ;;  %v1422_v50 = vadd.f32 %v667_v0, %v663_v16  ;;  %v1424_v7 = vadd.f32 %v667_v0, %v664_v61 }
  0x6f   :  { %v1426_v13 = vadd.f32 %v667_v0, %v665_v10  ;;  %v684_v18 = vmul.f32 0.2, %v668_v44  ;;  %v1428_v34 = vadd.f32 %v667_v0, %v666_v59  ;;  %v685_v19 = vmul.f32 0.2, %v669_v54 }
  0x70   :  { %v686_v35 = vmul.f32 0.2, %v670_v55  ;;  %v687_v36 = vmul.f32 0.2, %v671_v15  ;;  %v688_v17 = vmul.f32 0.2, %v1412_v33  ;;  %v1434_v49 = vstv %s1404_s3 }
  0x71   :  { %v689_v8 = vmul.f32 0.2, %v1414_v60  ;;  %v690_v3 = vmul.f32 0.2, %v1416_v57  ;;  %v691_v20 = vmul.f32 0.2, %v1418_v46  ;;  %v1677_v22 = vmax.f32 %v1236_v58, %v1267_v37 }
  0x72   :  { %v692_v61 = vmul.f32 0.2, %v676_v39  ;;  %v693_v21 = vmul.f32 0.2, %v677_v26  ;;  %v694_v24 = vmul.f32 0.2, %v678_v38  ;;  %v1678_v31 = vmax.f32 %v1238_v43, %v1272_v9 }
  0x73   :  { %v717_v23 = vmul.f32 %v1407_v48, %v1677_v22  ;;  %v695_v25 = vmul.f32 0.2, %v1420_v47  ;;  %v696_v29 = vmul.f32 0.2, %v1422_v50  ;;  %v697_v27 = vmul.f32 0.2, %v1424_v7 }
  0x74   :  { %v718_v12 = vmul.f32 %v1407_v48, %v1678_v31  ;;  %v698_v52 = vmul.f32 0.2, %v1426_v13  ;;  %v699_v2 = vmul.f32 0.2, %v1428_v34  ;;  %v700_v51 = vmax.f32 %v668_v44, %v684_v18 }
  0x75   :  { %v701_v58 = vmax.f32 %v669_v54, %v685_v19  ;;  %v702_v37 = vmax.f32 %v670_v55, %v686_v35  ;;  %v703_v1 = vmax.f32 %v671_v15, %v687_v36  ;;  %v704_v0 = vmax.f32 %v1412_v33, %v688_v17  ;;  %v1692_v35 = vld [vmem:[#allocation26_spill] sm:$0xff] }
  0x76   :  { %v705_v30 = vmax.f32 %v1414_v60, %v689_v8  ;;  %v706_v11 = vmax.f32 %v1416_v57, %v690_v3  ;;  %v707_v43 = vmax.f32 %v1418_v46, %v691_v20  ;;  %v708_v9 = vmax.f32 %v676_v39, %v692_v61  ;;  %v1695_v8 = vld [vmem:[#allocation27_spill] sm:$0xff]  ;;  %v1696_v3 = vld [vmem:[#allocation36_spill] sm:$0xff] }
  0x77   :  { %v709_v45 = vmax.f32 %v677_v26, %v693_v21  ;;  %v710_v5 = vmax.f32 %v678_v38, %v694_v24  ;;  %v711_v16 = vmax.f32 %v1420_v47, %v695_v25  ;;  %v712_v10 = vmax.f32 %v1422_v50, %v696_v29  ;;  %v1686_v50 = vld [vmem:[#allocation24_spill] sm:$0xff]  ;;  %v1699_v25 = vld [vmem:[#allocation37_spill] sm:$0xff] }
  0x78   :  { %v713_v59 = vmax.f32 %v1424_v7, %v697_v27  ;;  %v714_v44 = vmax.f32 %v1426_v13, %v698_v52  ;;  %v715_v54 = vmax.f32 %v1428_v34, %v699_v2  ;;  %v1679_v55 = vmax.f32 %v1240_v14, %v1275_v63  ;;  %v1687_v7 = vld [vmem:[#allocation33_spill] sm:$0xff]  ;;  %v1698_v24 = vld [vmem:[#allocation28_spill] sm:$0xff] }
  0x79   :  { %v1680_v33 = vmax.f32 %v1242_v40, %v1278_v62  ;;  %v1681_v57 = vmax.f32 %v1244_v41, %v1281_v28  ;;  %v734_v39 = vmul.f32 %v1410_v56, %v700_v51  ;;  %v735_v26 = vmul.f32 %v1410_v56, %v701_v58  ;;  %v1684_v62 = vld [vmem:[#allocation32_spill] sm:$0xff]  ;;  %v1701_v51 = vld [vmem:[#allocation29_spill] sm:$0xff]  ;;  %v1702_v58 = vld [vmem:[#allocation38_spill] sm:$0xff] }
  0x7a   :  { %v719_v15 = vmul.f32 %v1407_v48, %v1679_v55  ;;  %v1682_v38 = vmax.f32 %v1246_v6, %v1284_v32  ;;  %v1683_v63 = vmax.f32 %v1248_v42, %v1287_v53  ;;  %v1685_v47 = vmax.f32 %v1250_v4, %v1684_v62  ;;  %v1689_v6 = vld [vmem:[#allocation25_spill] sm:$0xff]  ;;  %v1690_v32 = vld [vmem:[#allocation34_spill] sm:$0xff]  ;;  %v1693_v4 = vld [vmem:[#allocation35_spill] sm:$0xff] }
  0x7b   :  { %v720_v60 = vmul.f32 %v1407_v48, %v1680_v33  ;;  %v721_v46 = vmul.f32 %v1407_v48, %v1681_v57  ;;  %v736_v28 = vmul.f32 %v1410_v56, %v702_v37  ;;  %v1688_v13 = vmax.f32 %v1686_v50, %v1687_v7  ;;  %v1705_v55 = vld [vmem:[#allocation39_spill] sm:$0xff] }
  0x7c   :  { %v722_v14 = vmul.f32 %v1407_v48, %v1682_v38  ;;  %v723_v40 = vmul.f32 %v1407_v48, %v1683_v63  ;;  %v724_v41 = vmul.f32 %v1407_v48, %v1685_v47  ;;  %v1691_v34 = vmax.f32 %v1689_v6, %v1690_v32  ;;  %v1707_v38 = vld [vmem:[#allocation31_spill] sm:$0xff]  ;;  %v1708_v63 = vld [vmem:[#allocation40_spill] sm:$0xff] }
  0x7d   :  { %v725_v18 = vmul.f32 %v1407_v48, %v1688_v13  ;;  %v737_v42 = vmul.f32 %v1410_v56, %v703_v1  ;;  %v742_v53 = vmul.f32 %v1410_v56, %v708_v9  ;;  %v1694_v36 = vmax.f32 %v1692_v35, %v1693_v4  ;;  %v1704_v9 = vld [vmem:[#allocation30_spill] sm:$0xff] }
  0x7e   :  { %v726_v19 = vmul.f32 %v1407_v48, %v1691_v34  ;;  %v1697_v20 = vmax.f32 %v1695_v8, %v1696_v3  ;;  %v743_v21 = vmul.f32 %v1410_v56, %v709_v45  ;;  %v744_v22 = vmul.f32 %v1410_v56, %v710_v5 }
  0x7f   :  { %v727_v17 = vmul.f32 %v1407_v48, %v1694_v36  ;;  %v1700_v29 = vmax.f32 %v1698_v24, %v1699_v25  ;;  %v738_v27 = vmul.f32 %v1410_v56, %v704_v0  ;;  %v750_v52 = vadd.f32 %v734_v39, %v717_v23 }
  0x80   :  { %v728_v61 = vmul.f32 %v1407_v48, %v1697_v20  ;;  %v751_v2 = vadd.f32 %v735_v26, %v718_v12  ;;  %v1703_v37 = vmax.f32 %v1701_v51, %v1702_v58  ;;  %v1706_v33 = vmax.f32 %v1704_v9, %v1705_v55 }
  0x81   :  { %v729_v31 = vmul.f32 %v1407_v48, %v1700_v29  ;;  %v745_v5 = vmul.f32 %v1410_v56, %v711_v16  ;;  %v752_v57 = vadd.f32 %v736_v28, %v719_v15  ;;  %v1709_v62 = vmax.f32 %v1707_v38, %v1708_v63 }
  0x82   :  { %v730_v1 = vmul.f32 %v1407_v48, %v1703_v37  ;;  %v731_v45 = vmul.f32 %v1407_v48, %v1706_v33  ;;  %v739_v23 = vmul.f32 %v1410_v56, %v705_v30  ;;  %v753_v12 = vadd.f32 %v737_v42, %v720_v60 }
  0x83   :  { %v732_v0 = vmul.f32 %v1407_v48, %v1709_v62  ;;  %v758_v39 = vadd.f32 %v742_v53, %v725_v18  ;;  %v740_v26 = vmul.f32 %v1410_v56, %v706_v11  ;;  %v746_v47 = vmul.f32 %v1410_v56, %v712_v10 }
  0x84   :  { %v759_v50 = vadd.f32 %v743_v21, %v726_v19  ;;  %v760_v7 = vadd.f32 %v744_v22, %v727_v17  ;;  %v741_v13 = vmul.f32 %v1410_v56, %v707_v43  ;;  %v754_v6 = vadd.f32 %v738_v27, %v721_v46 }
  0x85   :  { %v767_v16 = vadd.f32 %v1434_v49, %v750_v52  ;;  %v768_v15 = vadd.f32 %v1434_v49, %v751_v2  ;;  %v747_v28 = vmul.f32 %v1410_v56, %v713_v59  ;;  %v748_v48 = vmul.f32 %v1410_v56, %v714_v44 }
  0x86   :  { %v761_v30 = vadd.f32 %v745_v5, %v728_v61  ;;  %v769_v60 = vadd.f32 %v1434_v49, %v752_v57  ;;  %v749_v11 = vmul.f32 %v1410_v56, %v715_v54  ;;  %v755_v10 = vadd.f32 %v739_v23, %v722_v14 }
  0x87   :  { %v770_v18 = vadd.f32 %v1434_v49, %v753_v12  ;;  %v775_v43 = vadd.f32 %v1434_v49, %v758_v39  ;;  %v756_v46 = vadd.f32 %v740_v26, %v723_v40  ;;  %v762_v32 = vadd.f32 %v746_v47, %v729_v31 }
  0x88   :  { %v776_v34 = vadd.f32 %v1434_v49, %v759_v50  ;;  %v777_v19 = vadd.f32 %v1434_v49, %v760_v7  ;;  %v757_v59 = vadd.f32 %v741_v13, %v724_v41  ;;  %v771_v44 = vadd.f32 %v1434_v49, %v754_v6 }
  0x89   :  { %v783_v42 = vmul.f32 0.2, %v767_v16  ;;  %v784_v53 = vmul.f32 0.2, %v768_v15  ;;  %v763_v35 = vadd.f32 %v747_v28, %v730_v1  ;;  %v764_v4 = vadd.f32 %v748_v48, %v731_v45 }
  0x8a   :  { %v778_v56 = vadd.f32 %v1434_v49, %v761_v30  ;;  %v785_v54 = vmul.f32 0.2, %v769_v60  ;;  %v765_v14 = vadd.f32 %v749_v11, %v732_v0  ;;  %v772_v36 = vadd.f32 %v1434_v49, %v755_v10 }
  0x8b   :  { %v786_v17 = vmul.f32 0.2, %v770_v18  ;;  %v791_v40 = vmul.f32 0.2, %v775_v43  ;;  %v773_v8 = vadd.f32 %v1434_v49, %v756_v46  ;;  %v779_v3 = vadd.f32 %v1434_v49, %v762_v32 }
  0x8c   :  { %v792_v20 = vmul.f32 0.2, %v776_v34  ;;  %v793_v41 = vmul.f32 0.2, %v777_v19  ;;  %v774_v61 = vadd.f32 %v1434_v49, %v757_v59  ;;  %v787_v21 = vmul.f32 0.2, %v771_v44 }
  0x8d   :  { %v799_v22 = vmax.f32 %v767_v16, %v783_v42  ;;  %v800_v24 = vmax.f32 %v768_v15, %v784_v53  ;;  %v780_v25 = vadd.f32 %v1434_v49, %v763_v35  ;;  %v781_v29 = vadd.f32 %v1434_v49, %v764_v4 }
  0x8e   :  { %v794_v31 = vmul.f32 0.2, %v778_v56  ;;  %v801_v27 = vmax.f32 %v769_v60, %v785_v54  ;;  %v782_v52 = vadd.f32 %v1434_v49, %v765_v14  ;;  %v788_v2 = vmul.f32 0.2, %v772_v36 }
  0x8f   :  { %v802_v51 = vmax.f32 %v770_v18, %v786_v17  ;;  %v807_v58 = vmax.f32 %v775_v43, %v791_v40  ;;  %v789_v37 = vmul.f32 0.2, %v773_v8  ;;  %v795_v1 = vmul.f32 0.2, %v779_v3  ;;  %v887_v40 = vld [vmem:[%s1584_s1] sm:$0xff] }
  0x90   :  { %v808_v9 = vmax.f32 %v776_v34, %v792_v20  ;;  %v809_v55 = vmax.f32 %v777_v19, %v793_v41  ;;  %v790_v33 = vmul.f32 0.2, %v774_v61  ;;  %v803_v45 = vmax.f32 %v771_v44, %v787_v21 }
  0x91   :  { %v816_v5 = vsel %vm815_vm0, %v799_v22, 0.0  ;;  %v817_v57 = vsel %vm815_vm0, %v800_v24, 0.0  ;;  %v796_v38 = vmul.f32 0.2, %v780_v25  ;;  %v810_v63 = vmax.f32 %v778_v56, %v794_v31 }
  0x92   :  { %v818_v62 = vadd.f32 %v817_v57, %v816_v5  ;;  %v819_v0 = vsel %vm815_vm0, %v801_v27, 0.0  ;;  %v797_v49 = vmul.f32 0.2, %v781_v29  ;;  %v804_v23 = vmax.f32 %v772_v36, %v788_v2 }
  0x93   :  { %v821_v12 = vsel %vm815_vm0, %v802_v51, 0.0  ;;  %v831_v39 = vsel %vm815_vm0, %v807_v58, 0.0  ;;  %v811_v26 = vmax.f32 %v779_v3, %v795_v1  ;;  %v832_v50 = vsel %vm815_vm0, %v808_v9, 0.0 }
  0x94   :  { %v820_v47 = vadd.f32 %v819_v0, %v818_v62  ;;  %v834_v7 = vsel %vm815_vm0, %v809_v55, 0.0  ;;  %v805_v13 = vmax.f32 %v773_v8, %v789_v37  ;;  %v823_v6 = vsel %vm815_vm0, %v803_v45, 0.0 }
  0x95   :  { %v833_v16 = vadd.f32 %v832_v50, %v831_v39  ;;  %v798_v15 = vmul.f32 0.2, %v782_v52  ;;  %v812_v28 = vmax.f32 %v780_v25, %v796_v38  ;;  %v836_v30 = vsel %vm815_vm0, %v810_v63, 0.0 }
  0x96   :  { %v822_v48 = vadd.f32 %v821_v12, %v820_v47  ;;  %v806_v60 = vmax.f32 %v774_v61, %v790_v33  ;;  %v825_v11 = vsel %vm815_vm0, %v804_v23, 0.0  ;;  %v813_v18 = vmax.f32 %v781_v29, %v797_v49  ;;  %v888_v61 = vld [vmem:[%s1584_s1 + $0x8] sm:$0xff] }
  0x97   :  { %v835_v10 = vadd.f32 %v834_v7, %v833_v16  ;;  %v838_v46 = vsel %vm815_vm0, %v811_v26, 0.0  ;;  %v827_v32 = vsel %vm815_vm0, %v805_v13, 0.0  ;;  %v814_v19 = vmax.f32 %v782_v52, %v798_v15 }
  0x98   :  { %v824_v43 = vadd.f32 %v823_v6, %v822_v48  ;;  %v840_v44 = vsel %vm815_vm0, %v812_v28, 0.0  ;;  %v829_v42 = vsel %vm815_vm0, %v806_v60, 0.0  ;;  %v846_v35 = vstv %s1550_s4 }
  0x99   :  { %v837_v34 = vadd.f32 %v836_v30, %v835_v10  ;;  %v842_v56 = vsel %vm815_vm0, %v813_v18, 0.0  ;;  %v849_v14 = vstv %s1556_s5  ;;  %v844_v17 = vsel %vm815_vm0, %v814_v19, 0.0 }
  0x9a   :  { %v826_v59 = vadd.f32 %v825_v11, %v824_v43  ;;  %v847_v8 = vmul.f32 %v887_v40, %v846_v35  ;;  %v848_v21 = vmul.f32 %v888_v61, %v846_v35  ;;  %v854_v22 = vstv %s884_s6 }
  0x9b   :  { %v839_v53 = vadd.f32 %v838_v46, %v837_v34 }
  0x9c   :  { %v828_v4 = vadd.f32 %v827_v32, %v826_v59 }
  0x9d   :  { %v841_v54 = vadd.f32 %v840_v44, %v839_v53 }
  0x9e   :  { %v830_v36 = vadd.f32 %v829_v42, %v828_v4 }
  0x9f   :  { %v843_v3 = vadd.f32 %v842_v56, %v841_v54 }
  0xa0   :  { %v850_v20 = vmul.f32 %v849_v14, %v830_v36 }
  0xa1   :  { %v845_v41 = vadd.f32 %v844_v17, %v843_v3 }
  0xa2   :  { %v852_v24 = vadd.f32 %v850_v20, %v847_v8 }
  0xa3   :  { %v851_v25 = vmul.f32 %v849_v14, %v845_v41 }
  0xa4   :  { %v855_v29 = vadd.f32 %v854_v22, %v852_v24 }
  0xa5   :  { %v853_v31 = vadd.f32 %v851_v25, %v848_v21 }
  0xa6   :  { %v857_v27 = vmul.f32 0.2, %v855_v29 }
  0xa7   :  { %v856_v52 = vadd.f32 %v854_v22, %v853_v31 }
  0xa8   :  { %v859_v2 = vmax.f32 %v855_v29, %v857_v27 }
  0xa9   :  { %v858_v51 = vmul.f32 0.2, %v856_v52 }
  0xaa   :  { %861 = vst.msk [vmem:[%s1585_s2] sm:$0xff] %vm815_vm0, %v859_v2 }
  0xab   :  { %v860_v58 = vmax.f32 %v856_v52, %v858_v51 }
  0xad   :  { %862 = vst.msk [vmem:[%s1585_s2 + $0x8] sm:$0xff] %vm815_vm0, %v860_v58 }
  0xae   :  { %867 = vsyncpa [#allocation3], 1 }

</bundles_post_ra>
